<compile_context>
chip_gen: v5e
topology: v5e:2x2
jax: 0.10.0
libtpu: 0.0.40
codegen_flags: <defaults>
</compile_context>

<pallas_src>
import functools

import jax
import jax.numpy as jnp
from jax import lax
from jax.experimental import pallas as pl
from jax.experimental.pallas import tpu as pltpu


def _round_up(a, b):
    return ((a + b - 1) // b) * b


def _cdiv(a, b):
    return -(-a // b)


def _pair(v):
    return (v, v) if isinstance(v, int) else tuple(v)


def _ds(start, size, stride):
    """pl.ds that only asks for a strided access when it is actually strided."""
    if stride == 1 or size == 1:
        return pl.ds(start, size)
    return pl.ds(start, size, stride=stride)


def _maxpool_kernel(x_ref, o_ref, *, kh, kw, sh, sw, dh, dw, hout, wout, slab):
    """Max-pool one (Hp, Wp, TP) channels-last block.

    Planes live on the lane axis, W on the sublane axis, H on the major axis.
    Each of the kh*kw taps is read directly from the ref as a (possibly
    strided) slice, so live registers stay O(one output slab) instead of
    O(whole input block); the accumulation is chunked over output-row slabs.
    """
    for r_base in range(0, hout, slab):            # static unroll, small count
        rows = min(slab, hout - r_base)
        acc = None
        for ki in range(kh):                        # kh*kw is small
            for kj in range(kw):
                win = x_ref[_ds(r_base * sh + ki * dh, rows, sh),
                            _ds(kj * dw, wout, sw),
                            :]
                acc = win if acc is None else jnp.maximum(acc, win)
        o_ref[pl.ds(r_base, rows), :, :] = acc


def complex_max_pool2d(x, kernel_size, stride=None, padding=0, dilation=1,
                       return_indices=False, ceil_mode=False):
    """JAX/Pallas equivalent of ComplexMaxPool2d.forward (NCHW complex input)."""
    if return_indices:
        # TODO(synk): return_indices (argmax indices) not implemented.
        raise NotImplementedError("return_indices not supported")

    kh, kw = _pair(kernel_size)
    sh, sw = _pair(stride) if stride is not None else (kh, kw)
    ph, pw = _pair(padding)
    dh, dw = _pair(dilation)

    if 2 * ph > kh or 2 * pw > kw:
        # Match PyTorch's MaxPool2d validation.
        raise ValueError("pad should be at most half of kernel size")

    B, C, H, W = x.shape

    def out_size(inp, k, s, p, d):
        eff = d * (k - 1) + 1
        if ceil_mode:
            out = -(-(inp + 2 * p - eff) // s) + 1
            # PyTorch clamp: drop a window that starts entirely in the padding.
            if (out - 1) * s >= inp + p:
                out -= 1
            return out
        return (inp + 2 * p - eff) // s + 1

    hout = out_size(H, kh, sh, ph, dh)
    wout = out_size(W, kw, sw, pw, dw)

    # ---- channels-last layout: planes (= real/imag x B x C) on the lane axis
    # TODO(synk): the split + transpose is still an XLA pass over HBM; a
    # bitcast_convert_type view of the complex input (re/im interleaved) would
    # shave one more pass but is avoided here for portability.
    # TODO(synk): complex128 / half-precision complex inputs are computed in
    # float32 (output is complex64), unlike dtype-preserving torch.MaxPool2d.
    xr = jnp.real(x).astype(jnp.float32)
    xi = jnp.imag(x).astype(jnp.float32)
    P = 2 * B * C
    xs = jnp.stack([xr, xi], axis=0)                      # (2, B, C, H, W)
    xs = xs.transpose(3, 4, 0, 1, 2).reshape(H, W, P)     # (H, W, P)

    # Spatial -inf padding so every window tap is in bounds (covers padding,
    # dilation and ceil_mode); -inf is never selected by the max.
    h_need = (hout - 1) * sh + dh * (kh - 1) + 1
    w_need = (wout - 1) * sw + dw * (kw - 1) + 1
    pad_h_hi = max(h_need - (H + ph), 0)
    pad_w_hi = max(w_need - (W + pw), 0)
    Hp = H + ph + pad_h_hi
    Wp = W + pw + pad_w_hi

    # ---- generation-aware VMEM budget / lane tiling
    try:
        vmem_cap = int(pltpu.get_tpu_info().vmem_capacity_bytes)
    except Exception:  # pragma: no cover - conservative fallback (v7x per-TC)
        vmem_cap = 64 * 1024 * 1024

    in_bytes_per_lane = Hp * Wp * 4
    out_bytes_per_lane = hout * wout * 4
    # One (in + out) block <= cap/4 so the double-buffered pipeline stays
    # around half of physical VMEM with headroom.
    block_budget = vmem_cap // 4
    tp_budget = max(
        128,
        (block_budget // (in_bytes_per_lane + out_bytes_per_lane)) // 128 * 128)

    # Pick TP as a multiple of 128 that divides round_up(P,128): no wasted
    # padded-lane bandwidth from a P_pad overshoot.
    P_pad = _round_up(P, 128)
    nd = P_pad // 128
    best = 1
    for d in range(1, nd + 1):
        if nd % d == 0 and 128 * d <= tp_budget:
            best = d
    if best == nd and nd > 1:
        # Prefer >=2 grid steps so both v7x TensorCores get work.
        for d in range(nd - 1, 0, -1):
            if nd % d == 0 and 128 * d <= tp_budget:
                best = d
                break
    TP = 128 * best
    pad_lanes = P_pad - P
    # TODO(synk): very large H*W planes would additionally need spatial
    # (halo-aware) grid blocking; here the whole spatial plane stays resident
    # per grid step, bounded only by the lane tile.

    if ph or pw or pad_h_hi or pad_w_hi or pad_lanes:
        xs = jnp.pad(xs, ((ph, pad_h_hi), (pw, pad_w_hi), (0, pad_lanes)),
                     constant_values=float("-inf"))

    # Output-row slab size: keep the max-accumulator (slab, wout, TP) around
    # <=16 vregs, but bound the static unroll for compile time.
    lane_groups = max(1, TP // 128)
    sublane_groups = _cdiv(max(wout, 1), 8)
    slab = max(1, 16 // (lane_groups * sublane_groups))
    slab = min(slab, hout)
    max_slabs = max(1, 256 // (kh * kw))
    if _cdiv(hout, slab) > max_slabs:
        slab = _cdiv(hout, max_slabs)

    kernel = functools.partial(
        _maxpool_kernel, kh=kh, kw=kw, sh=sh, sw=sw, dh=dh, dw=dw,
        hout=hout, wout=wout, slab=slab)

    in_block_bytes = Hp * Wp * TP * 4
    out_block_bytes = hout * wout * TP * 4
    need = 2 * (in_block_bytes + out_block_bytes)          # double-buffered
    vmem_limit = max(need + (4 << 20), 32 << 20)
    vmem_limit = min(vmem_limit, (vmem_cap * 9) // 10)
    vmem_limit = max(vmem_limit, need + (1 << 20))

    cost = pl.CostEstimate(
        flops=int(kh * kw * hout * wout * P_pad),
        transcendentals=0,
        bytes_accessed=int((Hp * Wp + hout * wout) * P_pad * 4),
    )

    pooled = pl.pallas_call(
        kernel,
        out_shape=jax.ShapeDtypeStruct((hout, wout, P_pad), jnp.float32),
        grid_spec=pltpu.PrefetchScalarGridSpec(
            num_scalar_prefetch=0,
            grid=(P_pad // TP,),
            in_specs=[pl.BlockSpec((Hp, Wp, TP), lambda p: (0, 0, p))],
            out_specs=pl.BlockSpec((hout, wout, TP), lambda p: (0, 0, p)),
        ),
        compiler_params=pltpu.CompilerParams(
            dimension_semantics=("parallel",),
            vmem_limit_bytes=int(vmem_limit)),
        cost_estimate=cost,
    )(xs)

    y = pooled[:, :, :P].reshape(hout, wout, 2, B, C)
    y = y.transpose(2, 3, 4, 0, 1)                        # (2, B, C, hout, wout)
    return lax.complex(y[0], y[1])


def _reference(x, kernel_size, stride=None, padding=0):
    """Pure-JAX reference (reduce_window) for correctness checking."""
    kh, kw = _pair(kernel_size)
    sh, sw = _pair(stride) if stride is not None else (kh, kw)
    ph, pw = _pair(padding)

    def pool(part):
        return lax.reduce_window(
            part, -jnp.inf, lax.max,
            window_dimensions=(1, 1, kh, kw),
            window_strides=(1, 1, sh, sw),
            padding=((0, 0), (0, 0), (ph, ph), (pw, pw)))

    pr = pool(jnp.real(x).astype(jnp.float32))
    pi = pool(jnp.imag(x).astype(jnp.float32))
    return lax.complex(pr, pi)


if __name__ == "__main__":
    key = jax.random.PRNGKey(0)
    kr, ki = jax.random.split(key)
    B, C, H, W = 2, 4, 16, 16
    x_real = jax.random.normal(kr, (B, C, H, W), dtype=jnp.float32)
    x_imag = jax.random.normal(ki, (B, C, H, W), dtype=jnp.float32)
    x = lax.complex(x_real, x_imag)  # complex64, NCHW

    # Module config: kernel_size=2 (stride defaults to kernel_size, padding=0)
    out = complex_max_pool2d(x, kernel_size=2)
    out = jax.block_until_ready(out)

    ref = _reference(x, kernel_size=2)
    assert out.shape == (B, C, H // 2, W // 2), out.shape
    assert out.dtype == jnp.complex64, out.dtype
    assert jnp.allclose(jnp.real(out), jnp.real(ref)), "real part mismatch"
    assert jnp.allclose(jnp.imag(out), jnp.imag(ref)), "imag part mismatch"

    # Exercise the general path: 3x3 window, stride 2, padding 1.
    out2 = complex_max_pool2d(x, kernel_size=3, stride=2, padding=1)
    out2 = jax.block_until_ready(out2)
    ref2 = _reference(x, kernel_size=3, stride=2, padding=1)
    assert out2.shape == ref2.shape, (out2.shape, ref2.shape)
    assert jnp.allclose(jnp.real(out2), jnp.real(ref2)), "real part mismatch (3x3)"
    assert jnp.allclose(jnp.imag(out2), jnp.imag(ref2)), "imag part mismatch (3x3)"

    print("KERNEL_OK")
</pallas_src>

<mosaic_0001>
module attributes {stable_mosaic.version = 11 : i64} {
  func.func @_maxpool_kernel(%arg0: i32, %arg1: memref<16x16x128xf32, #tpu.memory_space<vmem>>, %arg2: memref<8x8x128xf32, #tpu.memory_space<vmem>>) attributes {dimension_semantics = [#tpu.dimension_semantics<parallel>], iteration_bounds = array<i64: 1>, scalar_prefetch = 0 : i64, scratch_operands = 0 : i64, tpu.core_type = #tpu.core_type<tc>, window_params = [{transform_indices = @transform_0, window_bounds = array<i64: 16, 16, 128>}, {transform_indices = @transform_1, window_bounds = array<i64: 8, 8, 128>}]} {
    %c0 = arith.constant 0 : index
    %c0_0 = arith.constant 0 : index
    %c0_1 = arith.constant 0 : index
    %0 = tpu.strided_load %arg1[%c0, %c0_0, %c0_1] {strides = array<i32: 2, 2, 1>} : memref<16x16x128xf32, #tpu.memory_space<vmem>>, vector<8x8x128xf32>
    %c0_2 = arith.constant 0 : index
    %c1 = arith.constant 1 : index
    %c0_3 = arith.constant 0 : index
    %1 = tpu.strided_load %arg1[%c0_2, %c1, %c0_3] {strides = array<i32: 2, 2, 1>} : memref<16x16x128xf32, #tpu.memory_space<vmem>>, vector<8x8x128xf32>
    %2 = arith.maximumf %0, %1 : vector<8x8x128xf32>
    %c1_4 = arith.constant 1 : index
    %c0_5 = arith.constant 0 : index
    %c0_6 = arith.constant 0 : index
    %3 = tpu.strided_load %arg1[%c1_4, %c0_5, %c0_6] {strides = array<i32: 2, 2, 1>} : memref<16x16x128xf32, #tpu.memory_space<vmem>>, vector<8x8x128xf32>
    %4 = arith.maximumf %2, %3 : vector<8x8x128xf32>
    %c1_7 = arith.constant 1 : index
    %c1_8 = arith.constant 1 : index
    %c0_9 = arith.constant 0 : index
    %5 = tpu.strided_load %arg1[%c1_7, %c1_8, %c0_9] {strides = array<i32: 2, 2, 1>} : memref<16x16x128xf32, #tpu.memory_space<vmem>>, vector<8x8x128xf32>
    %6 = arith.maximumf %4, %5 : vector<8x8x128xf32>
    %c0_10 = arith.constant 0 : index
    %c0_11 = arith.constant 0 : index
    %c0_12 = arith.constant 0 : index
    %7 = vector.load %arg2[%c0_10, %c0_11, %c0_12] : memref<8x8x128xf32, #tpu.memory_space<vmem>>, vector<8x8x128xf32>
    tpu.vector_store %arg2[%c0_10, %c0_11, %c0_12], %6 {strides = array<i32>} : memref<8x8x128xf32, #tpu.memory_space<vmem>>, vector<8x8x128xf32>,
    return
  }
  func.func @transform_0(%arg0: i32) -> (i32, i32, i32) {
    %c0_i32 = arith.constant 0 : i32
    %c0_i32_0 = arith.constant 0 : i32
    %c0_i32_1 = arith.constant 0 : i32
    return %c0_i32, %c0_i32_0, %arg0 : i32, i32, i32
  }
  func.func @transform_1(%arg0: i32) -> (i32, i32, i32) {
    %c0_i32 = arith.constant 0 : i32
    %c0_i32_0 = arith.constant 0 : i32
    %c0_i32_1 = arith.constant 0 : i32
    return %c0_i32, %c0_i32_0, %arg0 : i32, i32, i32
  }
}

</mosaic_0001>

<bundles_post_ra>
// kernel: tpu_custom_call.1
= control target key start
LH: loop header
LB: loop body
LE: loop exit
PB: predicated region body
PF: predicated region fallthrough
CT: control target
= control target key end

     0   :  { %6 = vsyncpa [#allocation3], 0  ;;  %s236_s0 = inlined_call_operand.hbm [shape: f32[16,16,128], index: 0, kind: input, shape index: {}]   ;;  %s237_s1 = inlined_call_operand.hbm [shape: f32[8,8,128], index: 1, kind: output, shape index: {}]  }
   0x1   :  { %7 = vsyncpa [#allocation4], 0  ;;  %s12_s8 = sshll.u32 %s236_s0, 4  ;;  %s210_s9 = smov [#allocation2]   ;;  %s13_s8 = int_to_ptr.hbm [resolvable:$true] %s12_s8 }
   0x2   :  { %s14_s10 = sshll.u32 %s210_s9, 4  ;;  %s211_s11 = smov 128   ;;  %s15_s10 = int_to_ptr.vmem [resolvable:$true] %s14_s10 }
   0x3   :  { %s212_s12 = smov 8  }
   0x4   :  { %20 = dma.hbm_to_vmem [thread:$0]  %s13_s8, 4096, %s15_s10, [#allocation3], %s211_s11, %s211_s11, %s212_s12  }
   0x5   :  { %206 = dma.done.wait [#allocation3], 4096  }
   0x6   :  { %207 = vsyncadd [#allocation3], 4294963200  ;;  %v25_v0 = vld [vmem:[#allocation2] ss:$2 sm:$0xff]  ;;  %v41_v1 = vld [vmem:[#allocation2 + $0x1] ss:$2 sm:$0xff] }
   0x7   :  { %v65_v2 = vld [vmem:[#allocation2 + $0x10] ss:$2 sm:$0xff]  ;;  %v56_v3 = vmax.f32 %v25_v0, %v41_v1  ;;  %v89_v4 = vld [vmem:[#allocation2 + $0x11] ss:$2 sm:$0xff]  ;;  %v27_v5 = vld [vmem:[#allocation2 + $0x20] ss:$2 sm:$0xff] }
   0x8   :  { %v43_v6 = vld [vmem:[#allocation2 + $0x21] ss:$2 sm:$0xff]  ;;  %v67_v8 = vld [vmem:[#allocation2 + $0x30] ss:$2 sm:$0xff]  ;;  %v91_v9 = vld [vmem:[#allocation2 + $0x31] ss:$2 sm:$0xff] }
   0x9   :  { %v57_v7 = vmax.f32 %v27_v5, %v43_v6  ;;  %v29_v10 = vld [vmem:[#allocation2 + $0x40] ss:$2 sm:$0xff]  ;;  %v80_v11 = vmax.f32 %v56_v3, %v65_v2  ;;  %v45_v12 = vld [vmem:[#allocation2 + $0x41] ss:$2 sm:$0xff]  ;;  %v69_v13 = vld [vmem:[#allocation2 + $0x50] ss:$2 sm:$0xff] }
   0xa   :  { %v93_v14 = vld [vmem:[#allocation2 + $0x51] ss:$2 sm:$0xff]  ;;  %v58_v16 = vmax.f32 %v29_v10, %v45_v12  ;;  %v31_v17 = vld [vmem:[#allocation2 + $0x60] ss:$2 sm:$0xff]  ;;  %v47_v18 = vld [vmem:[#allocation2 + $0x61] ss:$2 sm:$0xff] }
   0xb   :  { %v81_v15 = vmax.f32 %v57_v7, %v67_v8  ;;  %v71_v19 = vld [vmem:[#allocation2 + $0x70] ss:$2 sm:$0xff]  ;;  %v104_v20 = vmax.f32 %v80_v11, %v89_v4  ;;  %v59_v21 = vmax.f32 %v31_v17, %v47_v18  ;;  %v95_v22 = vld [vmem:[#allocation2 + $0x71] ss:$2 sm:$0xff]  ;;  %v33_v23 = vld [vmem:[#allocation2 + $0x80] ss:$2 sm:$0xff] }
   0xc   :  { %v49_v24 = vld [vmem:[#allocation2 + $0x81] ss:$2 sm:$0xff]  ;;  %v82_v26 = vmax.f32 %v58_v16, %v69_v13  ;;  %v73_v28 = vld [vmem:[#allocation2 + $0x90] ss:$2 sm:$0xff]  ;;  %v97_v29 = vld [vmem:[#allocation2 + $0x91] ss:$2 sm:$0xff] }
   0xd   :  { %v105_v25 = vmax.f32 %v81_v15, %v91_v9  ;;  %v60_v27 = vmax.f32 %v33_v23, %v49_v24  ;;  %v35_v30 = vld [vmem:[#allocation2 + $0xa0] ss:$2 sm:$0xff]  ;;  %112 = vst [vmem:[#allocation5] sm:$0xff] %v104_v20  ;;  %v83_v31 = vmax.f32 %v59_v21, %v71_v19  ;;  %v51_v32 = vld [vmem:[#allocation2 + $0xa1] ss:$2 sm:$0xff]  ;;  %s213_s0 = smov [#allocation5]  }
   0xe   :  { %v75_v33 = vld [vmem:[#allocation2 + $0xb0] ss:$2 sm:$0xff]  ;;  %v106_v34 = vmax.f32 %v82_v26, %v93_v14  ;;  %v61_v36 = vmax.f32 %v35_v30, %v51_v32  ;;  %v37_v37 = vld [vmem:[#allocation2 + $0xc0] ss:$2 sm:$0xff]  ;;  %v99_v39 = vld [vmem:[#allocation2 + $0xb1] ss:$2 sm:$0xff] }
   0xf   :  { %113 = vst [vmem:[#allocation5 + $0x8] sm:$0xff] %v105_v25  ;;  %v84_v35 = vmax.f32 %v60_v27, %v73_v28  ;;  %v107_v38 = vmax.f32 %v83_v31, %v95_v22  ;;  %v53_v40 = vld [vmem:[#allocation2 + $0xc1] ss:$2 sm:$0xff]  ;;  %v77_v41 = vld [vmem:[#allocation2 + $0xd0] ss:$2 sm:$0xff]  ;;  %s124_s13 = sshll.u32 %s213_s0, 4  ;;  %s125_s13 = int_to_ptr.vmem [resolvable:$true] %s124_s13 }
  0x10   :  { %114 = vst [vmem:[#allocation5 + $0x10] sm:$0xff] %v106_v34  ;;  %v85_v43 = vmax.f32 %v61_v36, %v75_v33  ;;  %v62_v44 = vmax.f32 %v37_v37, %v53_v40  ;;  %v39_v45 = vld [vmem:[#allocation2 + $0xe0] ss:$2 sm:$0xff]  ;;  %v55_v46 = vld [vmem:[#allocation2 + $0xe1] ss:$2 sm:$0xff]  ;;  %s126_s16 = sshll.u32 %s237_s1, 4  ;;  %s127_s16 = int_to_ptr.hbm [resolvable:$true] %s126_s16 }
  0x11   :  { %v108_v42 = vmax.f32 %v84_v35, %v97_v29  ;;  %115 = vst [vmem:[#allocation5 + $0x18] sm:$0xff] %v107_v38  ;;  %v101_v47 = vld [vmem:[#allocation2 + $0xd1] ss:$2 sm:$0xff]  ;;  %v63_v48 = vmax.f32 %v39_v45, %v55_v46  ;;  %v79_v49 = vld [vmem:[#allocation2 + $0xf0] ss:$2 sm:$0xff] }
  0x12   :  { %v109_v50 = vmax.f32 %v85_v43, %v99_v39  ;;  %v86_v51 = vmax.f32 %v62_v44, %v77_v41  ;;  %v103_v52 = vld [vmem:[#allocation2 + $0xf1] ss:$2 sm:$0xff] }
  0x13   :  { %116 = vst [vmem:[#allocation5 + $0x20] sm:$0xff] %v108_v42  ;;  %v87_v53 = vmax.f32 %v63_v48, %v79_v49 }
  0x14   :  { %117 = vst [vmem:[#allocation5 + $0x28] sm:$0xff] %v109_v50  ;;  %v110_v54 = vmax.f32 %v86_v51, %v101_v47 }
  0x15   :  { %v111_v55 = vmax.f32 %v87_v53, %v103_v52 }
  0x16   :  { %118 = vst [vmem:[#allocation5 + $0x30] sm:$0xff] %v110_v54 }
  0x17   :  { %119 = vst [vmem:[#allocation5 + $0x38] sm:$0xff] %v111_v55 }
  0x18   :  { %132 = dma.vmem_to_hbm [thread:$0]  %s125_s13, 1024, %s127_s16, [#allocation4], %s211_s11, %s211_s11, %s212_s12  }
  0x19   :  { %208 = dma.done.wait [#allocation4], 1024  }
  0x1a   :  { %209 = vsyncadd [#allocation4], 4294966272 }
  0x1b   :  { %137 = vsyncpa [#allocation3], 1 }
  0x1c   :  { %138 = vsyncpa [#allocation4], 1 }

</bundles_post_ra>
